<compile_context>
chip_gen: v6e
topology: v6e:2x2x1
jax: 0.10.0
libtpu: 0.0.40
codegen_flags: <defaults>
</compile_context>

<pallas_src>
import jax
import jax.numpy as jnp
from jax import lax
from jax.experimental import pallas as pl
from jax.experimental.pallas import tpu as pltpu

LANE = 128
SUBLANE = 8


def _round_up(x, m):
    return (x + m - 1) // m * m


def _matmul_bias_kernel(x_ref, w_ref, b_ref, o_ref):
    """One M-tile of the im2col'd conv.

    x_ref : (m_tile, K)     patch rows (K = KH*KW*Cin = 27)
    w_ref : (K, CPAD)       im2col'd weights, Cout zero-padded to 128 lanes
    b_ref : (1, CPAD)       zero-padded bias (f32)
    o_ref : (m_tile, CPAD)  lane-dense output slab
    """
    acc = jnp.dot(x_ref[...], w_ref[...], preferred_element_type=jnp.float32)
    o_ref[...] = (acc + b_ref[...]).astype(o_ref.dtype)


def _pick_m_tile(m_rows, target=1024):
    """Tile of the flattened B*OH*OW axis: multiple of 8, capped at `target`,
    and giving >= 2 grid steps whenever possible (v7x is 2 TC/chip)."""
    if m_rows <= SUBLANE:
        return SUBLANE
    half = _round_up(pl.cdiv(m_rows, 2), SUBLANE)
    return max(SUBLANE, min(target, half))


def _vmem_limit_bytes(m_tile, k, cpad, in_itemsize, out_itemsize):
    """Explicit scoped-VMEM request: double-buffered input/output blocks,
    resident weights/bias, f32 accumulator headroom.  Kept <= 48 MiB (v7x)."""
    need = (2 * m_tile * k * in_itemsize            # lhs blocks (double-buffered)
            + 2 * m_tile * cpad * out_itemsize      # output blocks
            + m_tile * cpad * 4                     # f32 accumulator
            + 2 * (k * cpad + cpad) * 4)            # weights + bias buffers
    return int(min(max(4 * need, 16 << 20), 48 << 20))


def conv2d_nhwc_pallas(x_nhwc, weight_oihw, bias, *, m_tile=None,
                       matmul_dtype=None):
    """NHWC conv core (VALID, stride 1).  Returns (B, OH, OW, Cout)."""
    B, H, W, Cin = x_nhwc.shape
    Cout, Cin_w, KH, KW = weight_oihw.shape
    assert Cin == Cin_w
    OH, OW = H - KH + 1, W - KW + 1
    K = KH * KW * Cin
    CPAD = _round_up(Cout, LANE)

    # Wrapper-side im2col (one pass in XLA, outside the kernel's inner loop).
    # Tap order is (kh, kw, cin); the weight flattening below matches it.
    taps = [x_nhwc[:, kh:kh + OH, kw:kw + OW, :]
            for kh in range(KH) for kw in range(KW)]
    patches = jnp.concatenate(taps, axis=-1)          # (B, OH, OW, K)
    patches = patches.reshape(B * OH * OW, K)         # (M, K)

    M = B * OH * OW
    if m_tile is None:
        m_tile = _pick_m_tile(M)
    m_tile = _round_up(m_tile, SUBLANE)
    M_pad = _round_up(M, m_tile)
    if M_pad != M:
        patches = jnp.pad(patches, ((0, M_pad - M), (0, 0)))

    # im2col'd weights: OIHW -> HWIO -> (K, Cout); Cout zero-padded to a lane
    # multiple so the kernel's output store is unmasked / lane-dense.
    w_flat = jnp.transpose(weight_oihw, (2, 3, 1, 0)).reshape(K, Cout)
    w_pad = jnp.pad(w_flat, ((0, 0), (0, CPAD - Cout)))
    b_pad = jnp.pad(bias, (0, CPAD - Cout)).reshape(1, CPAD).astype(jnp.float32)

    if matmul_dtype is not None:
        # Cast at the source (halves bytes through VMEM on v6e/v7x); f32 acc.
        patches = patches.astype(matmul_dtype)
        w_pad = w_pad.astype(matmul_dtype)

    grid = (M_pad // m_tile,)
    out_flat = pl.pallas_call(
        _matmul_bias_kernel,
        out_shape=jax.ShapeDtypeStruct((M_pad, CPAD), x_nhwc.dtype),
        grid_spec=pltpu.PrefetchScalarGridSpec(
            num_scalar_prefetch=0,
            grid=grid,
            in_specs=[
                pl.BlockSpec((m_tile, K), lambda i: (i, 0)),
                pl.BlockSpec((K, CPAD), lambda i: (0, 0)),
                pl.BlockSpec((1, CPAD), lambda i: (0, 0)),
            ],
            out_specs=pl.BlockSpec((m_tile, CPAD), lambda i: (i, 0)),
        ),
        compiler_params=pltpu.CompilerParams(
            dimension_semantics=("parallel",),
            vmem_limit_bytes=_vmem_limit_bytes(
                m_tile, K, CPAD,
                jnp.dtype(patches.dtype).itemsize,
                jnp.dtype(x_nhwc.dtype).itemsize),
        ),
    )(patches, w_pad, b_pad)

    # Crop lane / M padding and restore spatial dims (still NHWC).
    return out_flat[:M, :Cout].reshape(B, OH, OW, Cout)


def conv2d_pallas(x_nchw, weight_oihw, bias, *, m_tile=None, matmul_dtype=None):
    """Matches torch.nn.Conv2d(3, 64, 3) forward semantics (NCHW in/out)."""
    B, Cin, H, W = x_nchw.shape
    Cout, Cin_w, KH, KW = weight_oihw.shape
    assert Cin == Cin_w
    # TODO(synk): accept NHWC at the API boundary (and fuse the output crop into
    # the consumer) to avoid these extra full-HBM transpose passes; kept here to
    # honor the PyTorch NCHW Conv2d contract.
    x_nhwc = jnp.transpose(x_nchw, (0, 2, 3, 1))                     # (B, H, W, Cin)
    out_nhwc = conv2d_nhwc_pallas(x_nhwc, weight_oihw, bias,
                                  m_tile=m_tile, matmul_dtype=matmul_dtype)
    return jnp.transpose(out_nhwc, (0, 3, 1, 2))                     # (B, Cout, OH, OW)


if __name__ == "__main__":
    key = jax.random.PRNGKey(0)
    kx, kw_key, kb = jax.random.split(key, 3)

    # Small shapes consistent with Conv2d(3, 64, 3): NCHW input (2, 3, 16, 16).
    B, Cin, H, W = 2, 3, 16, 16
    Cout, KH, KW = 64, 3, 3

    x = jax.random.normal(kx, (B, Cin, H, W), dtype=jnp.float32)

    # Deterministic init mimicking PyTorch's uniform(-1/sqrt(fan_in), 1/sqrt(fan_in)).
    fan_in = Cin * KH * KW
    bound = 1.0 / jnp.sqrt(jnp.float32(fan_in))
    weight = jax.random.uniform(kw_key, (Cout, Cin, KH, KW), jnp.float32,
                                minval=-bound, maxval=bound)
    bias = jax.random.uniform(kb, (Cout,), jnp.float32,
                              minval=-bound, maxval=bound)

    out = jax.block_until_ready(conv2d_pallas(x, weight, bias))
    assert out.shape == (B, Cout, H - KH + 1, W - KW + 1), out.shape

    # Reference check against XLA's conv.
    ref = lax.conv_general_dilated(
        x, weight, window_strides=(1, 1), padding="VALID",
        dimension_numbers=("NCHW", "OIHW", "NCHW"),
    ) + bias.reshape(1, Cout, 1, 1)
    err = float(jnp.max(jnp.abs(out - ref)))
    assert jnp.allclose(out, ref, atol=1e-4, rtol=1e-4), err

    print("KERNEL_OK")
</pallas_src>

<mosaic_0001>
module attributes {stable_mosaic.version = 11 : i64} {
  func.func @_matmul_bias_kernel(%arg0: i32, %arg1: memref<200x27xf32, #tpu.memory_space<vmem>>, %arg2: memref<27x128xf32, #tpu.memory_space<vmem>>, %arg3: memref<1x128xf32, #tpu.memory_space<vmem>>, %arg4: memref<200x128xf32, #tpu.memory_space<vmem>>) attributes {dimension_semantics = [#tpu.dimension_semantics<parallel>], iteration_bounds = array<i64: 2>, scalar_prefetch = 0 : i64, scratch_operands = 0 : i64, tpu.core_type = #tpu.core_type<tc>, window_params = [{transform_indices = @transform_0, window_bounds = array<i64: 200, 27>}, {pipeline_mode = #tpu.pipeline_mode<synchronous>, transform_indices = @transform_1, window_bounds = array<i64: 27, 128>}, {pipeline_mode = #tpu.pipeline_mode<synchronous>, transform_indices = @transform_2, window_bounds = array<i64: 1, 128>}, {transform_indices = @transform_3, window_bounds = array<i64: 200, 128>}]} {
    %c0 = arith.constant 0 : index
    %c0_0 = arith.constant 0 : index
    %0 = vector.load %arg1[%c0, %c0_0] : memref<200x27xf32, #tpu.memory_space<vmem>>, vector<200x27xf32>
    %c0_1 = arith.constant 0 : index
    %c0_2 = arith.constant 0 : index
    %1 = vector.load %arg2[%c0_1, %c0_2] : memref<27x128xf32, #tpu.memory_space<vmem>>, vector<27x128xf32>
    %cst = arith.constant dense<0.000000e+00> : vector<200x128xf32>
    %2 = tpu.matmul %0, %1, %cst {dimension_numbers = #tpu.dot_dimension_numbers<[1], [0], [0], [1], [0, 0, 1, 1], [], []>} : vector<200x27xf32>, vector<27x128xf32>, vector<200x128xf32> -> vector<200x128xf32>
    %c0_3 = arith.constant 0 : index
    %c0_4 = arith.constant 0 : index
    %3 = vector.load %arg3[%c0_3, %c0_4] : memref<1x128xf32, #tpu.memory_space<vmem>>, vector<1x128xf32>
    %4 = vector.broadcast %3 : vector<1x128xf32> to vector<200x128xf32>
    %5 = arith.addf %2, %4 : vector<200x128xf32>
    %c0_5 = arith.constant 0 : index
    %c0_6 = arith.constant 0 : index
    %6 = vector.load %arg4[%c0_5, %c0_6] : memref<200x128xf32, #tpu.memory_space<vmem>>, vector<200x128xf32>
    tpu.vector_store %arg4[%c0_5, %c0_6], %5 {strides = array<i32>} : memref<200x128xf32, #tpu.memory_space<vmem>>, vector<200x128xf32>,
    return
  }
  func.func @transform_0(%arg0: i32) -> (i32, i32) {
    %c0_i32 = arith.constant 0 : i32
    %c0_i32_0 = arith.constant 0 : i32
    return %arg0, %c0_i32 : i32, i32
  }
  func.func @transform_1(%arg0: i32) -> (i32, i32) {
    %c0_i32 = arith.constant 0 : i32
    %c0_i32_0 = arith.constant 0 : i32
    %c0_i32_1 = arith.constant 0 : i32
    return %c0_i32, %c0_i32_0 : i32, i32
  }
  func.func @transform_2(%arg0: i32) -> (i32, i32) {
    %c0_i32 = arith.constant 0 : i32
    %c0_i32_0 = arith.constant 0 : i32
    %c0_i32_1 = arith.constant 0 : i32
    return %c0_i32, %c0_i32_0 : i32, i32
  }
  func.func @transform_3(%arg0: i32) -> (i32, i32) {
    %c0_i32 = arith.constant 0 : i32
    %c0_i32_0 = arith.constant 0 : i32
    return %arg0, %c0_i32 : i32, i32
  }
}

</mosaic_0001>

<bundles_post_ra>
// kernel: tpu_custom_call.1
= control target key start
LH: loop header
LB: loop body
LE: loop exit
PB: predicated region body
PF: predicated region fallthrough
CT: control target
= control target key end

     0   :  { %8 = vsyncpa [#allocation3], 0  ;;  %s1151_s0 = inlined_call_operand.vmem [shape: f32[400,27], index: 0, kind: input, shape index: {}]   ;;  %s1152_s1 = inlined_call_operand.vmem [shape: f32[27,128], index: 1, kind: input, shape index: {}]   ;;  %s1153_s2 = inlined_call_operand.vmem [shape: f32[1,128], index: 2, kind: input, shape index: {}]   ;;  %s1154_s3 = inlined_call_operand.hbm [shape: f32[400,128], index: 3, kind: output, shape index: {}]  }
   0x1   :  { %10 = vsyncpa [#allocation3 + $0x1], 0  ;;  %s866_s12 = smov 0   ;;  %s868_s13 = smov 0  }
   0x2   :  { %s870_s14 = smov 0   ;;  %s872_s15 = smov 0  }
   0x3 LB: > { %s887_s16 = sadd.s32 4294967295, %s839_s15   ;;  %s579_s17 = sadd.s32 4294967294, %s839_s15   ;;  %s839_s15 = sphi %s872_s15, %s1160_s15   ;;  %s835_s14 = sphi %s870_s14, %s1159_s14   ;;  %s831_s13 = sphi %s868_s13, %s1158_s13   ;;  %s827_s12 = sphi %s866_s12, %s1157_s12  }
   0x4   : > { %s891_s18 = sadd.s32 1, %s839_s15   ;;  %s91_s19 = sadd.s32 1, %s835_s14 }
   0x5   : > { %s88_s20 = ssub.s32 %s839_s15, %s891_s18  ;;  %p101_p0 = scmp.ne.s32.totalorder %s835_s14, %s831_s13 }
   0x6   : > { %p89_p1 = scmp.eq.s32.totalorder %s88_s20, 0  ;;  %p102_p2 = scmp.eq.s32.totalorder %s887_s16, 1 }
   0x7   : > { %p107_p3 = scmp.ne.s32.totalorder %s831_s13, %s827_s12  ;;  %p108_p4 = scmp.eq.s32.totalorder %s579_s17, 1 }
   0x8   : > { %s902_s21 = scalar_select %p89_p1, %s835_s14, %s91_s19  }
   0x9   : > { %p904_p5 = por %p102_p2, %p101_p0  ;;  %p908_p6 = por %p108_p4, %p107_p3 }
   0xa   : > { %p582_p7 = scmp.ge.s32.totalorder %s839_s15, 1  ;;  %p141_p8 = scmp.lt.s32.totalorder %s839_s15, 3 }
   0xc   : > { %p142_p9 = pnand %p582_p7, %p141_p8 }
   0xd   : > { %s165_s28 = smul.u32 (!%p142_p9), 25, %s887_s16  ;;  %s162_s10 = sand.u32 (!%p142_p9), 1, %s831_s13  }
   0xe   : > { %145 = sbr.rel (%p142_p9) target bundleno = 286 (0x11e), region = 32  ;;  %s843_s30 = smov (!%p142_p9), [#allocation2]  }
   0xf   : > { %p166_p10 = scmp.lt.s32.totalorder (!%p142_p9), %s165_s28, 49  ;;  %s735_s11 = smul.u32 (!%p142_p9), 200, %s162_s10 }
  0x10   : > { %s614_s24 = smul.u32 (!%p142_p9), 3200, %s887_s16  ;;  %s1111_s16 = scalar_lea.sflag (!%p142_p9), [#allocation3], %s162_s10 }
  0x11   : > { %s1050_s20 = scalar_lea.vmem (!%p142_p9), [#allocation2], %s735_s11  ;;  %s783_s4 = sshll.u32 (!%p142_p9), %s843_s30, 4  ;;  %s784_s4 = int_to_ptr.vmem [resolvable:$false] %s783_s4 }
  0x12   : > { %s517_s25 = sshll.u32 (!%p142_p9), %s1050_s20, 4  ;;  %s785_s5 = scalar_lea.vmem (!%p142_p9), %s784_s4, 6400  ;;  %s1105_s25 = int_to_ptr.vmem [resolvable:$true] %s517_s25 }
  0x13   : > { %v200_v0 = vld [vmem:[%s1152_s1 + $0x18] sm:$0x7]  ;;  %vm284_vm0 = vcmask 1042432   ;;  %v841_v1 = vmov 0.0   ;;  %v199_v2 = vld [vmem:[%s1152_s1 + $0x10] sm:$0xff]  ;;  %v198_v3 = vld [vmem:[%s1152_s1 + $0x8] sm:$0xff]  ;;  %p786_p0 = scmp.lt.s32.totalorder %s1105_s25, %s784_s4 }
  0x14   : > { %644 = vmatprep.subr.mxu0 %v841_v1  ;;  %727 = vmatprep.subr.mxu1 %v841_v1  ;;  %v197_v4 = vld [vmem:[%s1152_s1] sm:$0xff]  ;;  %s1162_s28 = smov (!%p166_p10, %s165_s28), 49  ;;  %vm842_vm1 = vmmov 0   ;;  %vm208_vm2 = vcmask 220160   ;;  %s779_s29 = scalar_lea.vmem %s1105_s25, 3200 }
  0x15   : > { %645 = vmatpush3.msk.msra.mxu0 %vm284_vm0, %v200_v0  ;;  %731 = vmatpush3.msk.msra.mxu1 %vm284_vm0, %v200_v0  ;;  %s583_s6 = sshll.u32 %s1162_s28, 3  ;;  %v1046_v30 = vld [vmem:[%s1153_s2] ss:$0 sm:$0xff]  ;;  %s1103_s28 = scalar_lea.hbm %s1154_s3, %s614_s24 }
  0x16   : > { %646 = vmatprep.subr.mxu0 %v841_v1  ;;  %728 = vmatprep.subr.mxu1 %v841_v1  ;;  %s940_s9 = scalar_lea.vmem %s1151_s0, %s583_s6  ;;  %p780_p11 = scmp.ne.s32.totalorder %s1105_s25, %s779_s29 }
  0x17   : > { %647 = vmatpush3.msra.mxu0 %v199_v2  ;;  %732 = vmatpush3.msra.mxu1 %v199_v2  ;;  %v172_v5 = vld [vmem:[%s940_s9] sm:$0xff]  ;;  %v185_v6 = vld [vmem:[%s940_s9 + $0x68] sm:$0xff]  ;;  %v186_v8 = vld [vmem:[%s940_s9 + $0x70] sm:$0xff]  ;;  %p787_p1 = scmp.lt.s32.totalorder %s785_s5, %s779_s29 }
  0x18   : > { %648 = vmatprep.subr.mxu0 %v841_v1  ;;  %729 = vmatprep.subr.mxu1 %v841_v1  ;;  %v173_v7 = vld [vmem:[%s940_s9 + $0x8] sm:$0xff]  ;;  %v174_v9 = vld [vmem:[%s940_s9 + $0x10] sm:$0xff]  ;;  %v187_v10 = vld [vmem:[%s940_s9 + $0x78] sm:$0xff]  ;;  %p781_p12 = pnand %p780_p11, %p904_p5 }
  0x19   : > { %649 = vmatpush3.msra.mxu0 %v198_v3  ;;  %733 = vmatpush3.msra.mxu1 %v198_v3  ;;  %v175_v11 = vld [vmem:[%s940_s9 + $0x18] sm:$0xff]  ;;  %v188_v12 = vld [vmem:[%s940_s9 + $0x80] sm:$0xff]  ;;  %v189_v14 = vld [vmem:[%s940_s9 + $0x88] sm:$0xff]  ;;  %p788_p2 = por %p787_p1, %p786_p0 }
  0x1a   : > { %650 = vmatprep.subr.mxu0 %v841_v1  ;;  %652 = vmatprep.mubr.msk.f32.mxu0 %vm842_vm1, %v841_v1  ;;  %v176_v13 = vld [vmem:[%s940_s9 + $0x20] sm:$0xff]  ;;  %v177_v15 = vld [vmem:[%s940_s9 + $0x28] sm:$0xff]  ;;  %v190_v16 = vld [vmem:[%s940_s9 + $0x90] sm:$0xff]  ;;  %p782_p13 = pneg %p781_p12 }
  0x1b   : > { %651 = vmatpush3.msra.mxu0 %v197_v4  ;;  %730 = vmatprep.subr.mxu1 %v841_v1  ;;  %v178_v17 = vld [vmem:[%s940_s9 + $0x30] sm:$0xff]  ;;  %v191_v18 = vld [vmem:[%s940_s9 + $0x98] sm:$0xff]  ;;  %v192_v20 = vld [vmem:[%s940_s9 + $0xa0] sm:$0xff] }
  0x1c   : > { %734 = vmatpush3.msra.mxu1 %v197_v4  ;;  %691 = vmatprep.mubr.msk.f32.mxu1 %vm842_vm1, %v841_v1  ;;  %v179_v19 = vld [vmem:[%s940_s9 + $0x38] sm:$0xff]  ;;  %v180_v21 = vld [vmem:[%s940_s9 + $0x40] sm:$0xff]  ;;  %v193_v22 = vld [vmem:[%s940_s9 + $0xa8] sm:$0xff]  ;;  %p789_p3 = pnand %p788_p2, %p782_p13 }
  0x1d   : > { %653 = vmatmul.mubr.msk.f32.vlgmr.msra.gmra.mxu0 %vm208_vm2, %v172_v5  ;;  %692 = vmatmul.mubr.msk.f32.vlgmr.msra.gmra.mxu1 %vm208_vm2, %v185_v6  ;;  %v181_v23 = vld [vmem:[%s940_s9 + $0x48] sm:$0xff]  ;;  %v194_v24 = vld [vmem:[%s940_s9 + $0xb0] sm:$0xff]  ;;  %v195_v26 = vld [vmem:[%s940_s9 + $0xb8] sm:$0xff] }
  0x1e   : > { %655 = vmatprep.mubr.msk.f32.mxu0 %vm842_vm1, %v841_v1  ;;  %694 = vmatprep.mubr.msk.f32.mxu1 %vm842_vm1, %v841_v1  ;;  %v182_v25 = vld [vmem:[%s940_s9 + $0x50] sm:$0xff]  ;;  %v183_v27 = vld [vmem:[%s940_s9 + $0x58] sm:$0xff]  ;;  %v196_v28 = vld [vmem:[%s940_s9 + $0xc0] sm:$0xff] }
  0x1f   : > { %v184_v29 = vld [vmem:[%s940_s9 + $0x60] sm:$0xff] }
  0x21   : > { %656 = vmatmul.mubr.msk.f32.gmra.mxu0 %vm208_vm2, %v173_v7  ;;  %695 = vmatmul.mubr.msk.f32.gmra.mxu1 %vm208_vm2, %v186_v8 }
  0x22   : > { %658 = vmatprep.mubr.msk.f32.mxu0 %vm842_vm1, %v841_v1  ;;  %697 = vmatprep.mubr.msk.f32.mxu1 %vm842_vm1, %v841_v1 }
  0x25   : > { %659 = vmatmul.mubr.msk.f32.gmra.mxu0 %vm208_vm2, %v174_v9  ;;  %698 = vmatmul.mubr.msk.f32.gmra.mxu1 %vm208_vm2, %v187_v10 }
  0x26   : > { %661 = vmatprep.mubr.msk.f32.mxu0 %vm842_vm1, %v841_v1  ;;  %700 = vmatprep.mubr.msk.f32.mxu1 %vm842_vm1, %v841_v1 }
  0x29   : > { %662 = vmatmul.mubr.msk.f32.gmra.mxu0 %vm208_vm2, %v175_v11  ;;  %701 = vmatmul.mubr.msk.f32.gmra.mxu1 %vm208_vm2, %v188_v12 }
  0x2a   : > { %664 = vmatprep.mubr.msk.f32.mxu0 %vm842_vm1, %v841_v1  ;;  %703 = vmatprep.mubr.msk.f32.mxu1 %vm842_vm1, %v841_v1 }
  0x2d   : > { %665 = vmatmul.mubr.msk.f32.gmra.mxu0 %vm208_vm2, %v176_v13  ;;  %704 = vmatmul.mubr.msk.f32.gmra.mxu1 %vm208_vm2, %v189_v14 }
  0x2e   : > { %667 = vmatprep.mubr.msk.f32.mxu0 %vm842_vm1, %v841_v1  ;;  %706 = vmatprep.mubr.msk.f32.mxu1 %vm842_vm1, %v841_v1 }
  0x31   : > { %668 = vmatmul.mubr.msk.f32.gmra.mxu0 %vm208_vm2, %v177_v15  ;;  %707 = vmatmul.mubr.msk.f32.gmra.mxu1 %vm208_vm2, %v190_v16 }
  0x32   : > { %670 = vmatprep.mubr.msk.f32.mxu0 %vm842_vm1, %v841_v1  ;;  %709 = vmatprep.mubr.msk.f32.mxu1 %vm842_vm1, %v841_v1 }
  0x35   : > { %671 = vmatmul.mubr.msk.f32.gmra.mxu0 %vm208_vm2, %v178_v17  ;;  %710 = vmatmul.mubr.msk.f32.gmra.mxu1 %vm208_vm2, %v191_v18 }
  0x36   : > { %673 = vmatprep.mubr.msk.f32.mxu0 %vm842_vm1, %v841_v1  ;;  %712 = vmatprep.mubr.msk.f32.mxu1 %vm842_vm1, %v841_v1 }
  0x39   : > { %674 = vmatmul.mubr.msk.f32.gmra.mxu0 %vm208_vm2, %v179_v19  ;;  %713 = vmatmul.mubr.msk.f32.gmra.mxu1 %vm208_vm2, %v192_v20 }
  0x3a   : > { %676 = vmatprep.mubr.msk.f32.mxu0 %vm842_vm1, %v841_v1  ;;  %715 = vmatprep.mubr.msk.f32.mxu1 %vm842_vm1, %v841_v1 }
  0x3d   : > { %677 = vmatmul.mubr.msk.f32.gmra.mxu0 %vm208_vm2, %v180_v21  ;;  %716 = vmatmul.mubr.msk.f32.gmra.mxu1 %vm208_vm2, %v193_v22 }
  0x3e   : > { %679 = vmatprep.mubr.msk.f32.mxu0 %vm842_vm1, %v841_v1  ;;  %718 = vmatprep.mubr.msk.f32.mxu1 %vm842_vm1, %v841_v1 }
  0x41   : > { %680 = vmatmul.mubr.msk.f32.gmra.mxu0 %vm208_vm2, %v181_v23  ;;  %719 = vmatmul.mubr.msk.f32.gmra.mxu1 %vm208_vm2, %v194_v24 }
  0x42   : > { %682 = vmatprep.mubr.msk.f32.mxu0 %vm842_vm1, %v841_v1  ;;  %721 = vmatprep.mubr.msk.f32.mxu1 %vm842_vm1, %v841_v1 }
  0x45   : > { %683 = vmatmul.mubr.msk.f32.gmra.mxu0 %vm208_vm2, %v182_v25  ;;  %722 = vmatmul.mubr.msk.f32.gmra.mxu1 %vm208_vm2, %v195_v26 }
  0x46   : > { %685 = vmatprep.mubr.msk.f32.mxu0 %vm842_vm1, %v841_v1  ;;  %724 = vmatprep.mubr.msk.f32.mxu1 %vm842_vm1, %v841_v1 }
  0x49   : > { %686 = vmatmul.mubr.msk.f32.gmra.mxu0 %vm208_vm2, %v183_v27  ;;  %725 = vmatmul.mubr.msk.f32.gmra.mxu1 %vm208_vm2, %v196_v28 }
  0x4a   : > { %688 = vmatprep.mubr.msk.f32.mxu0 %vm842_vm1, %v841_v1 }
  0x4d   : > { %689 = vmatmul.mubr.msk.f32.gmra.mxu0 %vm208_vm2, %v184_v29 }
  0xdd   : > { %v354_v31 = vpop.f32.mrf.mxu0  ;;  %v419_v32 = vpop.f32.mrf.mxu1 }
  0xde   : > { %v355_v33 = vadd.f32 %v1046_v30, %v354_v31  ;;  %v420_v34 = vadd.f32 %v1046_v30, %v419_v32 }
  0xdf   : > { %v654_v35 = vpop.f32.mrf.mxu0  ;;  %v693_v36 = vpop.f32.mrf.mxu1 }
  0xe0   : > { %478 = vst [vmem:[%s1050_s20] sm:$0xff] %v355_v33  ;;  %491 = vst [vmem:[%s1050_s20 + $0x68] sm:$0xff] %v420_v34 }
  0xe1   : > { %v359_v37 = vpop.f32.mrf.mxu0  ;;  %v424_v38 = vpop.f32.mrf.mxu1 }
  0xe2   : > { %v360_v39 = vadd.f32 %v1046_v30, %v359_v37  ;;  %v425_v40 = vadd.f32 %v1046_v30, %v424_v38 }
  0xe3   : > { %v657_v41 = vpop.f32.mrf.mxu0  ;;  %v696_v42 = vpop.f32.mrf.mxu1 }
  0xe4   : > { %479 = vst [vmem:[%s1050_s20 + $0x8] sm:$0xff] %v360_v39  ;;  %492 = vst [vmem:[%s1050_s20 + $0x70] sm:$0xff] %v425_v40 }
  0xe5   : > { %v364_v43 = vpop.f32.mrf.mxu0  ;;  %v429_v44 = vpop.f32.mrf.mxu1 }
  0xe6   : > { %v365_v45 = vadd.f32 %v1046_v30, %v364_v43  ;;  %v430_v46 = vadd.f32 %v1046_v30, %v429_v44 }
  0xe7   : > { %v660_v47 = vpop.f32.mrf.mxu0  ;;  %v699_v48 = vpop.f32.mrf.mxu1 }
  0xe8   : > { %480 = vst [vmem:[%s1050_s20 + $0x10] sm:$0xff] %v365_v45  ;;  %493 = vst [vmem:[%s1050_s20 + $0x78] sm:$0xff] %v430_v46 }
  0xe9   : > { %v369_v49 = vpop.f32.mrf.mxu0  ;;  %v434_v50 = vpop.f32.mrf.mxu1 }
  0xea   : > { %v370_v51 = vadd.f32 %v1046_v30, %v369_v49  ;;  %v435_v52 = vadd.f32 %v1046_v30, %v434_v50 }
  0xeb   : > { %v663_v53 = vpop.f32.mrf.mxu0  ;;  %v702_v54 = vpop.f32.mrf.mxu1 }
  0xec   : > { %481 = vst [vmem:[%s1050_s20 + $0x18] sm:$0xff] %v370_v51  ;;  %494 = vst [vmem:[%s1050_s20 + $0x80] sm:$0xff] %v435_v52 }
  0xed   : > { %v374_v55 = vpop.f32.mrf.mxu0  ;;  %v439_v56 = vpop.f32.mrf.mxu1 }
  0xee   : > { %v375_v57 = vadd.f32 %v1046_v30, %v374_v55  ;;  %v440_v58 = vadd.f32 %v1046_v30, %v439_v56 }
  0xef   : > { %v666_v59 = vpop.f32.mrf.mxu0  ;;  %v705_v60 = vpop.f32.mrf.mxu1 }
  0xf0   : > { %482 = vst [vmem:[%s1050_s20 + $0x20] sm:$0xff] %v375_v57  ;;  %495 = vst [vmem:[%s1050_s20 + $0x88] sm:$0xff] %v440_v58 }
  0xf1   : > { %v379_v61 = vpop.f32.mrf.mxu0  ;;  %v444_v62 = vpop.f32.mrf.mxu1 }
  0xf2   : > { %v380_v63 = vadd.f32 %v1046_v30, %v379_v61  ;;  %v445_v0 = vadd.f32 %v1046_v30, %v444_v62 }
  0xf3   : > { %v669_v1 = vpop.f32.mrf.mxu0  ;;  %v708_v2 = vpop.f32.mrf.mxu1 }
  0xf4   : > { %483 = vst [vmem:[%s1050_s20 + $0x28] sm:$0xff] %v380_v63  ;;  %496 = vst [vmem:[%s1050_s20 + $0x90] sm:$0xff] %v445_v0 }
  0xf5   : > { %v384_v3 = vpop.f32.mrf.mxu0  ;;  %v449_v4 = vpop.f32.mrf.mxu1 }
  0xf6   : > { %v385_v5 = vadd.f32 %v1046_v30, %v384_v3  ;;  %v450_v6 = vadd.f32 %v1046_v30, %v449_v4 }
  0xf7   : > { %v672_v7 = vpop.f32.mrf.mxu0  ;;  %v711_v8 = vpop.f32.mrf.mxu1 }
  0xf8   : > { %484 = vst [vmem:[%s1050_s20 + $0x30] sm:$0xff] %v385_v5  ;;  %497 = vst [vmem:[%s1050_s20 + $0x98] sm:$0xff] %v450_v6 }
  0xf9   : > { %v389_v9 = vpop.f32.mrf.mxu0  ;;  %v454_v10 = vpop.f32.mrf.mxu1 }
  0xfa   : > { %v390_v11 = vadd.f32 %v1046_v30, %v389_v9  ;;  %v455_v12 = vadd.f32 %v1046_v30, %v454_v10 }
  0xfb   : > { %v675_v13 = vpop.f32.mrf.mxu0  ;;  %v714_v14 = vpop.f32.mrf.mxu1 }
  0xfc   : > { %485 = vst [vmem:[%s1050_s20 + $0x38] sm:$0xff] %v390_v11  ;;  %498 = vst [vmem:[%s1050_s20 + $0xa0] sm:$0xff] %v455_v12 }
  0xfd   : > { %v394_v15 = vpop.f32.mrf.mxu0  ;;  %v459_v16 = vpop.f32.mrf.mxu1 }
  0xfe   : > { %v395_v17 = vadd.f32 %v1046_v30, %v394_v15  ;;  %v460_v18 = vadd.f32 %v1046_v30, %v459_v16 }
  0xff   : > { %v678_v19 = vpop.f32.mrf.mxu0  ;;  %v717_v20 = vpop.f32.mrf.mxu1 }
 0x100   : > { %486 = vst [vmem:[%s1050_s20 + $0x40] sm:$0xff] %v395_v17  ;;  %499 = vst [vmem:[%s1050_s20 + $0xa8] sm:$0xff] %v460_v18 }
 0x101   : > { %v399_v21 = vpop.f32.mrf.mxu0  ;;  %v464_v22 = vpop.f32.mrf.mxu1 }
 0x102   : > { %v400_v23 = vadd.f32 %v1046_v30, %v399_v21  ;;  %v465_v24 = vadd.f32 %v1046_v30, %v464_v22 }
 0x103   : > { %v681_v25 = vpop.f32.mrf.mxu0  ;;  %v720_v26 = vpop.f32.mrf.mxu1 }
 0x104   : > { %487 = vst [vmem:[%s1050_s20 + $0x48] sm:$0xff] %v400_v23  ;;  %500 = vst [vmem:[%s1050_s20 + $0xb0] sm:$0xff] %v465_v24 }
 0x105   : > { %v404_v27 = vpop.f32.mrf.mxu0  ;;  %v469_v28 = vpop.f32.mrf.mxu1 }
 0x106   : > { %v405_v29 = vadd.f32 %v1046_v30, %v404_v27  ;;  %v470_v31 = vadd.f32 %v1046_v30, %v469_v28 }
 0x107   : > { %v684_v32 = vpop.f32.mrf.mxu0  ;;  %v723_v33 = vpop.f32.mrf.mxu1 }
 0x108   : > { %488 = vst [vmem:[%s1050_s20 + $0x50] sm:$0xff] %v405_v29  ;;  %501 = vst [vmem:[%s1050_s20 + $0xb8] sm:$0xff] %v470_v31 }
 0x109   : > { %v409_v34 = vpop.f32.mrf.mxu0  ;;  %v474_v35 = vpop.f32.mrf.mxu1 }
 0x10a   : > { %v410_v36 = vadd.f32 %v1046_v30, %v409_v34  ;;  %v475_v37 = vadd.f32 %v1046_v30, %v474_v35 }
 0x10b   : > { %v687_v38 = vpop.f32.mrf.mxu0  ;;  %v726_v39 = vpop.f32.mrf.mxu1 }
 0x10c   : > { %489 = vst [vmem:[%s1050_s20 + $0x58] sm:$0xff] %v410_v36  ;;  %502 = vst [vmem:[%s1050_s20 + $0xc0] sm:$0xff] %v475_v37 }
 0x10d   : > { %v414_v40 = vpop.f32.mrf.mxu0 }
 0x10e   : > { %v415_v41 = vadd.f32 %v1046_v30, %v414_v40 }
 0x10f   : > { %v690_v42 = vpop.f32.mrf.mxu0 }
 0x110   : > { %490 = vst [vmem:[%s1050_s20 + $0x60] sm:$0xff] %v415_v41 }
 0x111   : > { %792 = shalt.err (!%p789_p3)
}
 0x112   : > { %s793_s6 = scalar_lea.hbm %s1103_s28, 3200  ;;  %s797_s9 = scalar_lea.hbm %s1154_s3, 6400 }
 0x113   : > { %p794_p4 = scmp.ne.s32.totalorder %s1103_s28, %s793_s6  ;;  %p798_p9 = scmp.lt.s32.totalorder %s1103_s28, %s1154_s3 }
 0x114   : > { %p799_p10 = scmp.lt.s32.totalorder %s797_s9, %s793_s6 }
 0x115   : > { %p795_p7 = pnand %p794_p4, %p904_p5 }
 0x116   : > { %p800_p11 = por %p799_p10, %p798_p9 }
 0x117   : > { %p796_p8 = pneg %p795_p7 }
 0x119   : > { %p801_p12 = pnand %p800_p11, %p796_p8 }
 0x11b   : > { %804 = shalt.err (!%p801_p12)
}
 0x11c   : > { %s844_s17 = smov 128   ;;  %s845_s19 = smov 8  }
 0x11d   : > { %736 = dma.vmem_to_hbm [thread:$0]  (%p904_p5), %s1105_s25, 3200, %s1103_s28, %s1111_s16, %s844_s17, %s844_s17, %s845_s19  }
 0x11e PF: > { %p742_p13 = scmp.ge.s32.totalorder %s839_s15, 2  ;;  %s532_s20 = sand.u32 1, %s827_s12  }
 0x11f   : > { %s533_s24 = scalar_lea.sflag [#allocation3], %s532_s20 }
 0x120   : > { %p739_p0 = pnand %p742_p13, %p908_p6 }
 0x122   : > { %p740_p1 = pneg %p739_p0 }
 0x124   : > { %822 = dma.done.wait (%p740_p1), %s533_s24, 3200  }
 0x125   : > { %824 = vsyncadd (%p740_p1), %s533_s24, 4294964096  ;;  %p13_p2 = scmp.ge.s32.totalorder %s891_s18, 4   ;;  %s1157_s12 = smov %s831_s13 }
 0x126   : > { %s1158_s13 = smov %s835_s14  ;;  %s1159_s14 = smov %s902_s21 }
 0x127   : > { %s1160_s15 = smov %s891_s18  ;;  %15 = sbr.rel (!%p13_p2) target bundleno = 3 (0x3), region = 67 }
 0x12c   :  { %538 = vsyncpa [#allocation3], 1 }
 0x12d   :  { %540 = vsyncpa [#allocation3 + $0x1], 1 }

</bundles_post_ra>
